<compile_context>
chip_gen: v5e
topology: v5e:2x2
jax: 0.10.0
libtpu: 0.0.40
codegen_flags: <defaults>
</compile_context>

<pallas_src>
import jax
import jax.numpy as jnp
from jax.experimental import pallas as pl
from jax.experimental.pallas import tpu as pltpu


# Packed-parameter layout (flat f32[40]):
#   [ 0:20)  w1[k, j]  (k in 0..3, j in 0..4), offset = k*5 + j
#   [20:25)  b1[j]
#   [25:35)  w2[k, j]  (k in 0..4, j in 0..1), offset = 25 + k*2 + j
#   [35:37)  b2[j]
#   [37:39)  w3[k, 0]
#   [39:40)  b3[0]
# NOTE: weights are stored [fan_in, fan_out] (transposed vs PyTorch's
# [out, in]); a PyTorch state_dict must be transposed before packing.
_W1, _B1, _W2, _B2, _W3, _B3 = 0, 20, 25, 35, 37, 39

_CH = 8  # sublane rows per compute chunk (one row-group of vregs)


def _lane_chunk(L):
    # Largest multiple-of-128 divisor of L that is <= 512 (keeps each slab at
    # <= 4 vregs so the fused chain's working set stays well under 64 vregs).
    for cl in (512, 384, 256, 128):
        if L % cl == 0:
            return cl
    return L


def area_net_kernel(p_ref, x_ref, o_ref):
    # p_ref: f32[40] packed params in SMEM (scalar reads, VPU-broadcast)
    # x_ref: (4, tb, L) f32 — feature x sublane-row x lane, fully dense
    # o_ref: (tb, L)   f32 — sublane- and lane-dense logits
    _, tb, L = x_ref.shape
    CL = _lane_chunk(L)
    n_row_chunks = tb // _CH
    n_lane_chunks = L // CL

    # ---- Hoist all parameter scalar reads out of the chunk loop. ----
    w1 = [[p_ref[_W1 + k * 5 + j] for j in range(5)] for k in range(4)]
    b1 = [p_ref[_B1 + j] for j in range(5)]
    w2 = [[p_ref[_W2 + k * 2 + j] for j in range(2)] for k in range(5)]
    b2 = [p_ref[_B2 + j] for j in range(2)]
    w3 = [p_ref[_W3], p_ref[_W3 + 1]]
    b3 = p_ref[_B3]

    @pl.loop(0, n_row_chunks)
    def _(c):
        r0 = pl.multiple_of(c * _CH, _CH)
        for lc in range(n_lane_chunks):        # static; usually 1 iteration
            l0 = lc * CL
            xs = [x_ref[k, pl.ds(r0, _CH), pl.ds(l0, CL)] for k in range(4)]

            # Layer 1: 4 -> 5, ReLU    h1[j] = relu(sum_k w1[k,j]*x[k] + b1[j])
            h1 = []
            for j in range(5):
                acc = w1[0][j] * xs[0]
                for k in range(1, 4):
                    acc = acc + w1[k][j] * xs[k]
                h1.append(jnp.maximum(acc + b1[j], 0.0))

            # Layer 2: 5 -> 2, ReLU
            h2 = []
            for j in range(2):
                acc = w2[0][j] * h1[0]
                for k in range(1, 5):
                    acc = acc + w2[k][j] * h1[k]
                h2.append(jnp.maximum(acc + b2[j], 0.0))

            # Layer 3: 2 -> 1
            out = w3[0] * h2[0] + w3[1] * h2[1] + b3
            o_ref[pl.ds(r0, _CH), pl.ds(l0, CL)] = out.astype(o_ref.dtype)


def pack_params(params):
    w1, b1, w2, b2, w3, b3 = params
    return jnp.concatenate([
        w1.reshape(-1), b1.reshape(-1),
        w2.reshape(-1), b2.reshape(-1),
        w3.reshape(-1), b3.reshape(-1),
    ]).astype(jnp.float32)                                 # f32[40]


def area_net_forward(x, params, *, tb=512, L=512):
    """x: [N, 4] float32 -> logits [N, 1] float32.

    tb: sublane rows per grid block (multiple of 8).
    L : lane width of the layout (multiple of 128).
    Default block (4, 512, 512) f32 = 4 MiB in / 1 MiB out per grid step.
    """
    N, F = x.shape
    assert F == 4
    assert L % 128 == 0, "lane width must be a multiple of 128"
    assert tb % 8 == 0, "sublane tile must be a multiple of 8"

    # Pad the batch so it fills an integer number of (tb_eff, L) blocks.
    rows_needed = (N + L - 1) // L
    tb_eff = min(tb, ((rows_needed + 7) // 8) * 8)         # clamp for small N
    rows = ((rows_needed + tb_eff - 1) // tb_eff) * tb_eff
    Np = rows * L
    grid = (rows // tb_eff,)

    # One fused pad+transpose copy (XLA): [N,4] -> [4, rows, L], zero tail.
    # Padded tail lanes produce nonzero values (ReLU(b1) propagates); they are
    # sliced off below — keep that invariant if output handling changes.
    xT = jnp.pad(x.astype(jnp.float32).T, ((0, 0), (0, Np - N)))
    x3 = xT.reshape(4, rows, L)
    p = pack_params(params)

    out = pl.pallas_call(
        area_net_kernel,
        out_shape=jax.ShapeDtypeStruct((rows, L), jnp.float32),
        grid_spec=pltpu.PrefetchScalarGridSpec(
            num_scalar_prefetch=0,
            grid=grid,
            in_specs=[
                # Single packed parameter buffer, resident in SMEM.
                pl.BlockSpec(memory_space=pltpu.MemorySpace.SMEM),
                # Sublane- and lane-dense input block: feature x rows x lanes.
                pl.BlockSpec((4, tb_eff, L), lambda i: (0, i, 0)),
            ],
            # Dense output slab.
            out_specs=pl.BlockSpec((tb_eff, L), lambda i: (i, 0)),
        ),
        compiler_params=pltpu.CompilerParams(
            dimension_semantics=("parallel",)),
    )(p, x3)

    return out.reshape(Np)[:N].reshape(N, 1)


def init_params(key):
    """Deterministic init mimicking nn.Linear's U(-1/sqrt(fan_in), 1/sqrt(fan_in))."""
    def linear(key, fan_in, fan_out):
        kw, kb = jax.random.split(key)
        bound = 1.0 / jnp.sqrt(jnp.float32(fan_in))
        # Stored as [fan_in, fan_out] (transposed vs PyTorch's [out, in]).
        w = jax.random.uniform(kw, (fan_in, fan_out), jnp.float32, -bound, bound)
        b = jax.random.uniform(kb, (fan_out,), jnp.float32, -bound, bound)
        return w, b

    k1, k2, k3 = jax.random.split(key, 3)
    w1, b1 = linear(k1, 4, 5)
    w2, b2 = linear(k2, 5, 2)
    w3, b3 = linear(k3, 2, 1)
    return (w1, b1, w2, b2, w3, b3)


def area_net_ref(x, params):
    w1, b1, w2, b2, w3, b3 = params
    h1 = jnp.maximum(x @ w1 + b1, 0.0)
    h2 = jnp.maximum(h1 @ w2 + b2, 0.0)
    return h2 @ w3 + b3


if __name__ == "__main__":
    key = jax.random.PRNGKey(0)
    kx, kp = jax.random.split(key)

    # Small, non-aligned batch: with tb=16, L=128 this exercises the padded
    # tail, a multi-step grid (grid=(2,)) and the in-kernel chunk loop (2
    # row-chunks per block).
    N = 2500
    x = jax.random.normal(kx, (N, 4), jnp.float32)
    params = init_params(kp)

    out = area_net_forward(x, params, tb=16, L=128)
    out = jax.block_until_ready(out)

    ref = area_net_ref(x, params)
    assert out.shape == (N, 1)
    assert jnp.allclose(out, ref, atol=1e-5, rtol=1e-4)

    print("KERNEL_OK")
</pallas_src>

<mosaic_0001>
module attributes {stable_mosaic.version = 11 : i64} {
  func.func @area_net_kernel(%arg0: i32, %arg1: memref<40xf32, #tpu.memory_space<smem>>, %arg2: memref<4x16x128xf32, #tpu.memory_space<vmem>>, %arg3: memref<16x128xf32, #tpu.memory_space<vmem>>) attributes {dimension_semantics = [#tpu.dimension_semantics<parallel>], iteration_bounds = array<i64: 2>, scalar_prefetch = 0 : i64, scratch_operands = 0 : i64, tpu.core_type = #tpu.core_type<tc>, window_params = [{transform_indices = @transform_0, window_bounds = array<i64: 40>}, {transform_indices = @transform_1, window_bounds = array<i64: 4, 16, 128>}, {transform_indices = @transform_2, window_bounds = array<i64: 16, 128>}]} {
    %c0 = arith.constant 0 : index
    %0 = memref.load %arg1[%c0] : memref<40xf32, #tpu.memory_space<smem>>
    %c1 = arith.constant 1 : index
    %1 = memref.load %arg1[%c1] : memref<40xf32, #tpu.memory_space<smem>>
    %c2 = arith.constant 2 : index
    %2 = memref.load %arg1[%c2] : memref<40xf32, #tpu.memory_space<smem>>
    %c3 = arith.constant 3 : index
    %3 = memref.load %arg1[%c3] : memref<40xf32, #tpu.memory_space<smem>>
    %c4 = arith.constant 4 : index
    %4 = memref.load %arg1[%c4] : memref<40xf32, #tpu.memory_space<smem>>
    %c5 = arith.constant 5 : index
    %5 = memref.load %arg1[%c5] : memref<40xf32, #tpu.memory_space<smem>>
    %c6 = arith.constant 6 : index
    %6 = memref.load %arg1[%c6] : memref<40xf32, #tpu.memory_space<smem>>
    %c7 = arith.constant 7 : index
    %7 = memref.load %arg1[%c7] : memref<40xf32, #tpu.memory_space<smem>>
    %c8 = arith.constant 8 : index
    %8 = memref.load %arg1[%c8] : memref<40xf32, #tpu.memory_space<smem>>
    %c9 = arith.constant 9 : index
    %9 = memref.load %arg1[%c9] : memref<40xf32, #tpu.memory_space<smem>>
    %c10 = arith.constant 10 : index
    %10 = memref.load %arg1[%c10] : memref<40xf32, #tpu.memory_space<smem>>
    %c11 = arith.constant 11 : index
    %11 = memref.load %arg1[%c11] : memref<40xf32, #tpu.memory_space<smem>>
    %c12 = arith.constant 12 : index
    %12 = memref.load %arg1[%c12] : memref<40xf32, #tpu.memory_space<smem>>
    %c13 = arith.constant 13 : index
    %13 = memref.load %arg1[%c13] : memref<40xf32, #tpu.memory_space<smem>>
    %c14 = arith.constant 14 : index
    %14 = memref.load %arg1[%c14] : memref<40xf32, #tpu.memory_space<smem>>
    %c15 = arith.constant 15 : index
    %15 = memref.load %arg1[%c15] : memref<40xf32, #tpu.memory_space<smem>>
    %c16 = arith.constant 16 : index
    %16 = memref.load %arg1[%c16] : memref<40xf32, #tpu.memory_space<smem>>
    %c17 = arith.constant 17 : index
    %17 = memref.load %arg1[%c17] : memref<40xf32, #tpu.memory_space<smem>>
    %c18 = arith.constant 18 : index
    %18 = memref.load %arg1[%c18] : memref<40xf32, #tpu.memory_space<smem>>
    %c19 = arith.constant 19 : index
    %19 = memref.load %arg1[%c19] : memref<40xf32, #tpu.memory_space<smem>>
    %c20 = arith.constant 20 : index
    %20 = memref.load %arg1[%c20] : memref<40xf32, #tpu.memory_space<smem>>
    %c21 = arith.constant 21 : index
    %21 = memref.load %arg1[%c21] : memref<40xf32, #tpu.memory_space<smem>>
    %c22 = arith.constant 22 : index
    %22 = memref.load %arg1[%c22] : memref<40xf32, #tpu.memory_space<smem>>
    %c23 = arith.constant 23 : index
    %23 = memref.load %arg1[%c23] : memref<40xf32, #tpu.memory_space<smem>>
    %c24 = arith.constant 24 : index
    %24 = memref.load %arg1[%c24] : memref<40xf32, #tpu.memory_space<smem>>
    %c25 = arith.constant 25 : index
    %25 = memref.load %arg1[%c25] : memref<40xf32, #tpu.memory_space<smem>>
    %c26 = arith.constant 26 : index
    %26 = memref.load %arg1[%c26] : memref<40xf32, #tpu.memory_space<smem>>
    %c27 = arith.constant 27 : index
    %27 = memref.load %arg1[%c27] : memref<40xf32, #tpu.memory_space<smem>>
    %c28 = arith.constant 28 : index
    %28 = memref.load %arg1[%c28] : memref<40xf32, #tpu.memory_space<smem>>
    %c29 = arith.constant 29 : index
    %29 = memref.load %arg1[%c29] : memref<40xf32, #tpu.memory_space<smem>>
    %c30 = arith.constant 30 : index
    %30 = memref.load %arg1[%c30] : memref<40xf32, #tpu.memory_space<smem>>
    %c31 = arith.constant 31 : index
    %31 = memref.load %arg1[%c31] : memref<40xf32, #tpu.memory_space<smem>>
    %c32 = arith.constant 32 : index
    %32 = memref.load %arg1[%c32] : memref<40xf32, #tpu.memory_space<smem>>
    %c33 = arith.constant 33 : index
    %33 = memref.load %arg1[%c33] : memref<40xf32, #tpu.memory_space<smem>>
    %c34 = arith.constant 34 : index
    %34 = memref.load %arg1[%c34] : memref<40xf32, #tpu.memory_space<smem>>
    %c35 = arith.constant 35 : index
    %35 = memref.load %arg1[%c35] : memref<40xf32, #tpu.memory_space<smem>>
    %c36 = arith.constant 36 : index
    %36 = memref.load %arg1[%c36] : memref<40xf32, #tpu.memory_space<smem>>
    %c37 = arith.constant 37 : index
    %37 = memref.load %arg1[%c37] : memref<40xf32, #tpu.memory_space<smem>>
    %c38 = arith.constant 38 : index
    %38 = memref.load %arg1[%c38] : memref<40xf32, #tpu.memory_space<smem>>
    %c39 = arith.constant 39 : index
    %39 = memref.load %arg1[%c39] : memref<40xf32, #tpu.memory_space<smem>>
    %c0_i32 = arith.constant 0 : i32
    %c2_i32 = arith.constant 2 : i32
    %40 = arith.addi %c0_i32, %c2_i32 : i32
    %c1_i32 = arith.constant 1 : i32
    scf.for %arg4 = %c0_i32 to %40 step %c1_i32  : i32 {
      %c1_i32_1 = arith.constant 1 : i32
      %41 = arith.muli %arg4, %c1_i32_1 : i32
      %c0_i32_2 = arith.constant 0 : i32
      %42 = arith.addi %c0_i32_2, %41 : i32
      %c8_i32 = arith.constant 8 : i32
      %43 = arith.muli %42, %c8_i32 : i32
      %44 = tpu.assume_multiple %43, 8 : i32
      %c0_3 = arith.constant 0 : index
      %45 = arith.index_cast %44 : i32 to index
      %c0_4 = arith.constant 0 : index
      %46 = vector.load %arg2[%c0_3, %45, %c0_4] : memref<4x16x128xf32, #tpu.memory_space<vmem>>, vector<1x8x128xf32>
      %47 = vector.shape_cast %46 : vector<1x8x128xf32> to vector<8x128xf32>
      %c1_5 = arith.constant 1 : index
      %48 = arith.index_cast %44 : i32 to index
      %c0_6 = arith.constant 0 : index
      %49 = vector.load %arg2[%c1_5, %48, %c0_6] : memref<4x16x128xf32, #tpu.memory_space<vmem>>, vector<1x8x128xf32>
      %50 = vector.shape_cast %49 : vector<1x8x128xf32> to vector<8x128xf32>
      %c2_7 = arith.constant 2 : index
      %51 = arith.index_cast %44 : i32 to index
      %c0_8 = arith.constant 0 : index
      %52 = vector.load %arg2[%c2_7, %51, %c0_8] : memref<4x16x128xf32, #tpu.memory_space<vmem>>, vector<1x8x128xf32>
      %53 = vector.shape_cast %52 : vector<1x8x128xf32> to vector<8x128xf32>
      %c3_9 = arith.constant 3 : index
      %54 = arith.index_cast %44 : i32 to index
      %c0_10 = arith.constant 0 : index
      %55 = vector.load %arg2[%c3_9, %54, %c0_10] : memref<4x16x128xf32, #tpu.memory_space<vmem>>, vector<1x8x128xf32>
      %56 = vector.shape_cast %55 : vector<1x8x128xf32> to vector<8x128xf32>
      %57 = vector.broadcast %0 : f32 to vector<8x128xf32>
      %58 = arith.mulf %57, %47 : vector<8x128xf32>
      %59 = vector.broadcast %5 : f32 to vector<8x128xf32>
      %60 = arith.mulf %59, %50 : vector<8x128xf32>
      %61 = arith.addf %58, %60 : vector<8x128xf32>
      %62 = vector.broadcast %10 : f32 to vector<8x128xf32>
      %63 = arith.mulf %62, %53 : vector<8x128xf32>
      %64 = arith.addf %61, %63 : vector<8x128xf32>
      %65 = vector.broadcast %15 : f32 to vector<8x128xf32>
      %66 = arith.mulf %65, %56 : vector<8x128xf32>
      %67 = arith.addf %64, %66 : vector<8x128xf32>
      %68 = vector.broadcast %20 : f32 to vector<8x128xf32>
      %69 = arith.addf %67, %68 : vector<8x128xf32>
      %cst = arith.constant 0.000000e+00 : f32
      %70 = vector.broadcast %cst : f32 to vector<8x128xf32>
      %71 = arith.maximumf %69, %70 : vector<8x128xf32>
      %72 = vector.broadcast %1 : f32 to vector<8x128xf32>
      %73 = arith.mulf %72, %47 : vector<8x128xf32>
      %74 = vector.broadcast %6 : f32 to vector<8x128xf32>
      %75 = arith.mulf %74, %50 : vector<8x128xf32>
      %76 = arith.addf %73, %75 : vector<8x128xf32>
      %77 = vector.broadcast %11 : f32 to vector<8x128xf32>
      %78 = arith.mulf %77, %53 : vector<8x128xf32>
      %79 = arith.addf %76, %78 : vector<8x128xf32>
      %80 = vector.broadcast %16 : f32 to vector<8x128xf32>
      %81 = arith.mulf %80, %56 : vector<8x128xf32>
      %82 = arith.addf %79, %81 : vector<8x128xf32>
      %83 = vector.broadcast %21 : f32 to vector<8x128xf32>
      %84 = arith.addf %82, %83 : vector<8x128xf32>
      %cst_11 = arith.constant 0.000000e+00 : f32
      %85 = vector.broadcast %cst_11 : f32 to vector<8x128xf32>
      %86 = arith.maximumf %84, %85 : vector<8x128xf32>
      %87 = vector.broadcast %2 : f32 to vector<8x128xf32>
      %88 = arith.mulf %87, %47 : vector<8x128xf32>
      %89 = vector.broadcast %7 : f32 to vector<8x128xf32>
      %90 = arith.mulf %89, %50 : vector<8x128xf32>
      %91 = arith.addf %88, %90 : vector<8x128xf32>
      %92 = vector.broadcast %12 : f32 to vector<8x128xf32>
      %93 = arith.mulf %92, %53 : vector<8x128xf32>
      %94 = arith.addf %91, %93 : vector<8x128xf32>
      %95 = vector.broadcast %17 : f32 to vector<8x128xf32>
      %96 = arith.mulf %95, %56 : vector<8x128xf32>
      %97 = arith.addf %94, %96 : vector<8x128xf32>
      %98 = vector.broadcast %22 : f32 to vector<8x128xf32>
      %99 = arith.addf %97, %98 : vector<8x128xf32>
      %cst_12 = arith.constant 0.000000e+00 : f32
      %100 = vector.broadcast %cst_12 : f32 to vector<8x128xf32>
      %101 = arith.maximumf %99, %100 : vector<8x128xf32>
      %102 = vector.broadcast %3 : f32 to vector<8x128xf32>
      %103 = arith.mulf %102, %47 : vector<8x128xf32>
      %104 = vector.broadcast %8 : f32 to vector<8x128xf32>
      %105 = arith.mulf %104, %50 : vector<8x128xf32>
      %106 = arith.addf %103, %105 : vector<8x128xf32>
      %107 = vector.broadcast %13 : f32 to vector<8x128xf32>
      %108 = arith.mulf %107, %53 : vector<8x128xf32>
      %109 = arith.addf %106, %108 : vector<8x128xf32>
      %110 = vector.broadcast %18 : f32 to vector<8x128xf32>
      %111 = arith.mulf %110, %56 : vector<8x128xf32>
      %112 = arith.addf %109, %111 : vector<8x128xf32>
      %113 = vector.broadcast %23 : f32 to vector<8x128xf32>
      %114 = arith.addf %112, %113 : vector<8x128xf32>
      %cst_13 = arith.constant 0.000000e+00 : f32
      %115 = vector.broadcast %cst_13 : f32 to vector<8x128xf32>
      %116 = arith.maximumf %114, %115 : vector<8x128xf32>
      %117 = vector.broadcast %4 : f32 to vector<8x128xf32>
      %118 = arith.mulf %117, %47 : vector<8x128xf32>
      %119 = vector.broadcast %9 : f32 to vector<8x128xf32>
      %120 = arith.mulf %119, %50 : vector<8x128xf32>
      %121 = arith.addf %118, %120 : vector<8x128xf32>
      %122 = vector.broadcast %14 : f32 to vector<8x128xf32>
      %123 = arith.mulf %122, %53 : vector<8x128xf32>
      %124 = arith.addf %121, %123 : vector<8x128xf32>
      %125 = vector.broadcast %19 : f32 to vector<8x128xf32>
      %126 = arith.mulf %125, %56 : vector<8x128xf32>
      %127 = arith.addf %124, %126 : vector<8x128xf32>
      %128 = vector.broadcast %24 : f32 to vector<8x128xf32>
      %129 = arith.addf %127, %128 : vector<8x128xf32>
      %cst_14 = arith.constant 0.000000e+00 : f32
      %130 = vector.broadcast %cst_14 : f32 to vector<8x128xf32>
      %131 = arith.maximumf %129, %130 : vector<8x128xf32>
      %132 = vector.broadcast %25 : f32 to vector<8x128xf32>
      %133 = arith.mulf %132, %71 : vector<8x128xf32>
      %134 = vector.broadcast %27 : f32 to vector<8x128xf32>
      %135 = arith.mulf %134, %86 : vector<8x128xf32>
      %136 = arith.addf %133, %135 : vector<8x128xf32>
      %137 = vector.broadcast %29 : f32 to vector<8x128xf32>
      %138 = arith.mulf %137, %101 : vector<8x128xf32>
      %139 = arith.addf %136, %138 : vector<8x128xf32>
      %140 = vector.broadcast %31 : f32 to vector<8x128xf32>
      %141 = arith.mulf %140, %116 : vector<8x128xf32>
      %142 = arith.addf %139, %141 : vector<8x128xf32>
      %143 = vector.broadcast %33 : f32 to vector<8x128xf32>
      %144 = arith.mulf %143, %131 : vector<8x128xf32>
      %145 = arith.addf %142, %144 : vector<8x128xf32>
      %146 = vector.broadcast %35 : f32 to vector<8x128xf32>
      %147 = arith.addf %145, %146 : vector<8x128xf32>
      %cst_15 = arith.constant 0.000000e+00 : f32
      %148 = vector.broadcast %cst_15 : f32 to vector<8x128xf32>
      %149 = arith.maximumf %147, %148 : vector<8x128xf32>
      %150 = vector.broadcast %26 : f32 to vector<8x128xf32>
      %151 = arith.mulf %150, %71 : vector<8x128xf32>
      %152 = vector.broadcast %28 : f32 to vector<8x128xf32>
      %153 = arith.mulf %152, %86 : vector<8x128xf32>
      %154 = arith.addf %151, %153 : vector<8x128xf32>
      %155 = vector.broadcast %30 : f32 to vector<8x128xf32>
      %156 = arith.mulf %155, %101 : vector<8x128xf32>
      %157 = arith.addf %154, %156 : vector<8x128xf32>
      %158 = vector.broadcast %32 : f32 to vector<8x128xf32>
      %159 = arith.mulf %158, %116 : vector<8x128xf32>
      %160 = arith.addf %157, %159 : vector<8x128xf32>
      %161 = vector.broadcast %34 : f32 to vector<8x128xf32>
      %162 = arith.mulf %161, %131 : vector<8x128xf32>
      %163 = arith.addf %160, %162 : vector<8x128xf32>
      %164 = vector.broadcast %36 : f32 to vector<8x128xf32>
      %165 = arith.addf %163, %164 : vector<8x128xf32>
      %cst_16 = arith.constant 0.000000e+00 : f32
      %166 = vector.broadcast %cst_16 : f32 to vector<8x128xf32>
      %167 = arith.maximumf %165, %166 : vector<8x128xf32>
      %168 = vector.broadcast %37 : f32 to vector<8x128xf32>
      %169 = arith.mulf %168, %149 : vector<8x128xf32>
      %170 = vector.broadcast %38 : f32 to vector<8x128xf32>
      %171 = arith.mulf %170, %167 : vector<8x128xf32>
      %172 = arith.addf %169, %171 : vector<8x128xf32>
      %173 = vector.broadcast %39 : f32 to vector<8x128xf32>
      %174 = arith.addf %172, %173 : vector<8x128xf32>
      %175 = arith.index_cast %44 : i32 to index
      %c0_17 = arith.constant 0 : index
      %176 = vector.load %arg3[%175, %c0_17] : memref<16x128xf32, #tpu.memory_space<vmem>>, vector<8x128xf32>
      tpu.vector_store %arg3[%175, %c0_17], %174 {strides = array<i32>} : memref<16x128xf32, #tpu.memory_space<vmem>>, vector<8x128xf32>,
    }
    %c2_i32_0 = arith.constant 2 : i32
    return
  }
  func.func @transform_0(%arg0: i32) -> i32 {
    %c0_i32 = arith.constant 0 : i32
    %c0_i32_0 = arith.constant 0 : i32
    return %c0_i32 : i32
  }
  func.func @transform_1(%arg0: i32) -> (i32, i32, i32) {
    %c0_i32 = arith.constant 0 : i32
    %c0_i32_0 = arith.constant 0 : i32
    %c0_i32_1 = arith.constant 0 : i32
    return %c0_i32, %arg0, %c0_i32_0 : i32, i32, i32
  }
  func.func @transform_2(%arg0: i32) -> (i32, i32) {
    %c0_i32 = arith.constant 0 : i32
    %c0_i32_0 = arith.constant 0 : i32
    return %arg0, %c0_i32 : i32, i32
  }
}

</mosaic_0001>

<bundles_post_ra>
// kernel: tpu_custom_call.1
= control target key start
LH: loop header
LB: loop body
LE: loop exit
PB: predicated region body
PF: predicated region fallthrough
CT: control target
= control target key end

     0   :  { %s1041_s0 = inlined_call_operand.hbm [shape: f32[40], index: 0, kind: input, shape index: {}]   ;;  %s1042_s1 = inlined_call_operand.hbm [shape: f32[4,32,128], index: 1, kind: input, shape index: {}]   ;;  %s1043_s2 = inlined_call_operand.hbm [shape: f32[32,128], index: 2, kind: output, shape index: {}]  }
   0x1   :  { %1057 = sst [smem:[#allocation46_spill]] %s1041_s0 }
   0x2   :  { %1058 = sst [smem:[#allocation47_spill]] %s1042_s1 }
   0x3   :  { %1059 = sst [smem:[#allocation48_spill]] %s1043_s2 }
   0x4   :  { %7 = vsyncpa [#allocation5], 0 }
   0x5   :  { %8 = vsyncpa [#allocation3], 0 }
   0x6   :  { %10 = vsyncpa [#allocation3 + $0x1], 0 }
   0x7   :  { %11 = vsyncpa [#allocation4], 0 }
   0x8   :  { %13 = vsyncpa [#allocation4 + $0x1], 0  ;;  %s755_s9 = smov 0   ;;  %s757_s10 = smov 0  }
   0x9   :  { %s759_s11 = smov 0   ;;  %s761_s12 = smov 0  }
   0xa LB: > { %1060 = sst [smem:[#allocation14_spill]] %s713_s9  ;;  %s776_s13 = sadd.s32 4294967295, %s725_s12   ;;  %s725_s12 = sphi %s761_s12, %s1130_s12   ;;  %s721_s11 = sphi %s759_s11, %s1133_s11   ;;  %s717_s10 = sphi %s757_s10, %s1132_s10   ;;  %s713_s9 = sphi %s755_s9, %s1131_s9  }
   0xb   : > { %1061 = sst [smem:[#allocation15_spill]] %s717_s10  ;;  %s495_s14 = sadd.s32 4294967294, %s725_s12  }
   0xc   : > { %1062 = sst [smem:[#allocation16_spill]] %s721_s11  ;;  %s780_s15 = sadd.s32 1, %s725_s12  }
   0xd   : > { %1063 = sst [smem:[#allocation17_spill]] %s725_s12  ;;  %s47_s16 = sadd.s32 1, %s721_s11 }
   0xe   : > { %1064 = sst [smem:[#allocation18_spill]] %s776_s13  ;;  %s44_s17 = ssub.s32 %s725_s12, %s780_s15 }
   0xf   : > { %1065 = sst [smem:[#allocation19_spill]] %s780_s15  ;;  %p54_p0 = scmp.ne.s32.totalorder %s721_s11, %s717_s10 }
  0x10   : > { %p45_p1 = scmp.eq.s32.totalorder %s44_s17, 0  ;;  %p55_p2 = scmp.eq.s32.totalorder %s725_s12, 0 }
  0x11   : > { %p60_p3 = scmp.ne.s32.totalorder %s717_s10, %s713_s9  ;;  %p61_p4 = scmp.eq.s32.totalorder %s776_s13, 0 }
  0x12   : > { %s792_s18 = scalar_select %p45_p1, %s721_s11, %s47_s16  }
  0x13   : > { %p794_p5 = por %p55_p2, %p54_p0  ;;  %p800_p6 = por %p61_p4, %p60_p3 }
  0x14   : > { %1066 = sst [smem:[#allocation20_spill]] %s792_s18  ;;  %p84_p7 = scmp.eq.s32.totalorder %s776_s13, 1 }
  0x15   : > { %p90_p8 = scmp.eq.s32.totalorder %s495_s14, 1  ;;  %p496_p9 = scmp.ge.s32.totalorder %s725_s12, 1 }
  0x16   : > { %p97_p10 = scmp.lt.s32.totalorder %s725_s12, 3  ;;  %p807_p11 = por %p84_p7, %p54_p0 }
  0x17   : > { %p811_p12 = por %p90_p8, %p60_p3  ;;  %s1074_s0 = sld [smem:[#allocation46_spill]] }
  0x18   : > { %s1069_s21 = scalar_select %p807_p11, 1, 0 }
  0x19   : > { %s1071_s22 = scalar_select %p811_p12, 1, 0 }
  0x1a   : > { %1070 = sst [smem:[#allocation21_spill]] %s1069_s21  ;;  %p815_p13 = pnand %p496_p9, %p97_p10 }
  0x1b   : > { %1072 = sst [smem:[#allocation22_spill]] %s1071_s22  ;;  %s731_s27 = smov [#allocation2]  }
  0x1c   : > { %p576_p1 = pneg %p815_p13  ;;  %p498_p2 = scmp.ge.s32.totalorder %s725_s12, 2 }
  0x1d   : > { %s109_s26 = sshll.u32 %s1074_s0, 4  ;;  %s110_s26 = int_to_ptr.hbm [resolvable:$true] %s109_s26 }
  0x1e   : > { %p577_p0 = pnand %p576_p1, %p61_p4  ;;  %116 = sbr.rel (%p498_p2) target bundleno = 49 (0x31), region = 20 }
  0x20   : > { %579 = dma.hbm_to_smem (!%p577_p0), %s110_s26, 16, %s731_s27, [#allocation5]  }
  0x23   : > { %s120_s28 = sand.u32 1, %s721_s11   ;;  %s559_s29 = sshll.u32 %s725_s12, 4 }
  0x24   : > { %s499_s30 = sshll.u32 %s120_s28, 6  ;;  %s1075_s1 = sld [smem:[#allocation47_spill]] }
  0x25   : > { %s563_s6 = scalar_select %p794_p5, [#allocation0], [#allocation10] }
  0x26   : > { %s124_s8 = scalar_lea.vmem [#allocation6], %s499_s30  ;;  %s732_s17 = smov 512  }
  0x27   : > { %s144_s14 = sshll.u32 %s124_s8, 4  ;;  %s134_s16 = sld [smem:[%s563_s6]]   ;;  %s145_s14 = int_to_ptr.vmem [resolvable:$true] %s144_s14 }
  0x28   : > { %564 = sst [smem:[#allocation9]] (%p794_p5), %s732_s17  ;;  %s733_s24 = smov 256  }
  0x29   : > { %565 = sst [smem:[#allocation9 + $0x1]] (%p794_p5), %s733_s24  ;;  %s734_s25 = smov 2  }
  0x2a   : > { %s129_s5 = scalar_lea.hbm %s1075_s1, %s559_s29  ;;  %566 = sst [smem:[#allocation9 + $0x2]] (%p794_p5), %s734_s25 }
  0x2b   : > { %s142_s7 = sshll.u32 %s129_s5, 4  ;;  %s735_s26 = smov 128   ;;  %s143_s7 = int_to_ptr.hbm [resolvable:$true] %s142_s7 }
  0x2c   : > { %567 = sst [smem:[#allocation9 + $0x3]] (%p794_p5), %s735_s26  ;;  %s736_s30 = smov 8  }
  0x2d   : > { %s502_s27 = sshll.u32 %s134_s16, 26  ;;  %568 = sst [smem:[#allocation9 + $0x4]] (%p794_p5), %s735_s26 }
  0x2e   : > { %s503_s29 = sadd.s32 134217728, %s502_s27  ;;  %569 = sst [smem:[#allocation9 + $0x5]] (%p794_p5), %s736_s30 }
  0x2f   : > { %s121_s3 = scalar_lea.sflag [#allocation3], %s120_s28  ;;  %s737_s4 = smov [#allocation8]  }
  0x30   : > { %570 = dma.general (%p794_p5), %s143_s7, 1024, %s145_s14, %s121_s3, %s737_s4, [#allocation9], %s503_s29, 0  }
  0x31 PF: > { %169 = sbr.rel (%p815_p13) target bundleno = 184 (0xb8), region = 28 }
  0x36   : > { %700 = dma.done.wait (%p61_p4), [#allocation5], 16  }
  0x37   : > { %702 = vsyncadd (%p61_p4), [#allocation5], 4294967280  ;;  %s857_s5 = sand.u32 1, %s717_s10  }
  0x38   : > { %1076 = sst [smem:[#allocation23_spill]] %s857_s5  ;;  %s506_s28 = sshll.u32 %s857_s5, 6 }
  0x39   : > { %s177_s6 = scalar_lea.sflag [#allocation3], %s857_s5  ;;  %s861_s19 = scalar_lea.vmem [#allocation6], %s506_s28 }
  0x3a   : > { %704 = dma.done.wait (%p800_p6), %s177_s6, 1024  }
  0x3b   : > { %706 = vsyncadd (%p800_p6), %s177_s6, 4294966272 }
  0x3c   : > { %186 = sfence }
  0x3d   : > { %s868_s7 = sld [smem:[#allocation2]] }
  0x3e   : > { %s870_s8 = sld [smem:[#allocation2 + $0x1]] }
  0x3f   : > { %s872_s14 = sld [smem:[#allocation2 + $0x2]] }
  0x40   : > { %s874_s16 = sld [smem:[#allocation2 + $0x3]] }
  0x41   : > { %s876_s17 = sld [smem:[#allocation2 + $0x4]] }
  0x42   : > { %s878_s24 = sld [smem:[#allocation2 + $0x5]] }
  0x43   : > { %1077 = sst [smem:[#allocation24_spill]] %s868_s7 }
  0x44   : > { %1078 = sst [smem:[#allocation25_spill]] %s870_s8 }
  0x45   : > { %s880_s25 = sld [smem:[#allocation2 + $0x6]] }
  0x46   : > { %s882_s26 = sld [smem:[#allocation2 + $0x7]] }
  0x47   : > { %1079 = sst [smem:[#allocation26_spill]] %s876_s17 }
  0x48   : > { %s884_s20 = sld [smem:[#allocation2 + $0x8]] }
  0x49   : > { %s886_s27 = sld [smem:[#allocation2 + $0x9]] }
  0x4a   : > { %s888_s29 = sld [smem:[#allocation2 + $0xa]] }
  0x4b   : > { %s890_s30 = sld [smem:[#allocation2 + $0xb]] }
  0x4c   : > { %s892_s3 = sld [smem:[#allocation2 + $0xc]] }
  0x4d   : > { %s894_s4 = sld [smem:[#allocation2 + $0xd]] }
  0x4e   : > { %s896_s28 = sld [smem:[#allocation2 + $0xe]] }
  0x4f   : > { %1080 = sst [smem:[#allocation27_spill]] %s886_s27 }
  0x50   : > { %s898_s6 = sld [smem:[#allocation2 + $0xf]] }
  0x51   : > { %s900_s23 = sld [smem:[#allocation2 + $0x10]] }
  0x52   : > { %1081 = sst [smem:[#allocation28_spill]] %s892_s3 }
  0x53   : > { %1082 = sst [smem:[#allocation29_spill]] %s894_s4 }
  0x54   : > { %1083 = sst [smem:[#allocation30_spill]] %s896_s28 }
  0x55   : > { %s902_s0 = sld [smem:[#allocation2 + $0x11]] }
  0x56   : > { %1084 = sst [smem:[#allocation31_spill]] %s898_s6 }
  0x57   : > { %s904_s1 = sld [smem:[#allocation2 + $0x12]] }
  0x58   : > { %s906_s18 = sld [smem:[#allocation2 + $0x13]] }
  0x59   : > { %s908_s11 = sld [smem:[#allocation2 + $0x14]] }
  0x5a   : > { %s910_s10 = sld [smem:[#allocation2 + $0x15]] }
  0x5b   : > { %1085 = sst [smem:[#allocation32_spill]] %s902_s0 }
  0x5c   : > { %s912_s15 = sld [smem:[#allocation2 + $0x16]] }
  0x5d   : > { %1086 = sst [smem:[#allocation33_spill]] %s904_s1 }
  0x5e   : > { %1087 = sst [smem:[#allocation34_spill]] %s906_s18 }
  0x5f   : > { %1088 = sst [smem:[#allocation35_spill]] %s908_s11 }
  0x60   : > { %1089 = sst [smem:[#allocation36_spill]] %s910_s10 }
  0x61   : > { %s914_s12 = sld [smem:[#allocation2 + $0x17]] }
  0x62   : > { %s916_s22 = sld [smem:[#allocation2 + $0x18]] }
  0x63   : > { %s918_s9 = sld [smem:[#allocation2 + $0x19]] }
  0x64   : > { %s920_s2 = sld [smem:[#allocation2 + $0x1a]] }
  0x65   : > { %s922_s21 = sld [smem:[#allocation2 + $0x1b]] }
  0x66   : > { %s924_s13 = sld [smem:[#allocation2 + $0x1c]] }
  0x67   : > { %1090 = sst [smem:[#allocation37_spill]] %s914_s12 }
  0x68   : > { %1091 = sst [smem:[#allocation38_spill]] %s916_s22 }
  0x69   : > { %1092 = sst [smem:[#allocation39_spill]] %s918_s9 }
  0x6a   : > { %1093 = sst [smem:[#allocation40_spill]] %s920_s2 }
  0x6b   : > { %1094 = sst [smem:[#allocation41_spill]] %s922_s21 }
  0x6c   : > { %1095 = sst [smem:[#allocation42_spill]] %s924_s13 }
  0x6d   : > { %s926_s18 = sld [smem:[#allocation2 + $0x1d]] }
  0x6e   : > { %s928_s28 = sld [smem:[#allocation2 + $0x1e]] }
  0x6f   : > { %s930_s27 = sld [smem:[#allocation2 + $0x1f]] }
  0x70   : > { %s932_s17 = sld [smem:[#allocation2 + $0x20]] }
  0x71   : > { %s934_s12 = sld [smem:[#allocation2 + $0x21]] }
  0x72   : > { %s936_s22 = sld [smem:[#allocation2 + $0x22]] }
  0x73   : > { %1096 = sst [smem:[#allocation43_spill]] %s926_s18  ;;  %s1099_s18 = sshll.u32 %s857_s5, 4 }
  0x74   : > { %1097 = sst [smem:[#allocation44_spill]] %s928_s28  ;;  %s950_s28 = scalar_lea.vmem [#allocation7], %s1099_s18 }
  0x75   : > { %1098 = sst [smem:[#allocation45_spill]] %s930_s27  ;;  %s952_s27 = smov 0  }
  0x76   : > { %s938_s1 = sld [smem:[#allocation2 + $0x23]] }
  0x77   : > { %s940_s9 = sld [smem:[#allocation2 + $0x24]] }
  0x78   : > { %s942_s2 = sld [smem:[#allocation2 + $0x25]] }
  0x79   : > { %s944_s21 = sld [smem:[#allocation2 + $0x26]] }
  0x7a   : > { %s946_s13 = sld [smem:[#allocation2 + $0x27]] }
  0x7b LB: >> { %s1100_s7 = sld [smem:[#allocation24_spill]]  ;;  %v265_v1 = vstv %s878_s24  ;;  %v268_v2 = vstv %s888_s29  ;;  %v279_v6 = vstv %s880_s25  ;;  %v282_v7 = vstv %s890_s30  ;;  %s1056_s18 = sshll.u32 %s729_s27, 3  ;;  %s729_s27 = sphi %s952_s27, %s250_s27  }
  0x7c   : >> { %s1101_s6 = sld [smem:[#allocation31_spill]]  ;;  %v285_v8 = vstv %s900_s23  ;;  %v291_v10 = vstv %s872_s14  ;;  %v293_v11 = vstv %s882_s26  ;;  %s252_s5 = scalar_lea.vmem %s861_s19, %s1056_s18 [#allocation6]  ;;  %v302_v14 = vstv %s912_s15 }
  0x7d   : >> { %s1102_s11 = sld [smem:[#allocation35_spill]]  ;;  %v305_v15 = vstv %s874_s16  ;;  %v253_v16 = vld [vmem:[%s252_s5] sm:$0xff]  ;;  %v549_v17 = vld [vmem:[%s252_s5 + $0x10] sm:$0xff]  ;;  %v307_v19 = vstv %s884_s20 }
  0x7e   : >> { %s1103_s8 = sld [smem:[#allocation25_spill]]  ;;  %v551_v18 = vld [vmem:[%s252_s5 + $0x20] sm:$0xff]  ;;  %v553_v20 = vld [vmem:[%s252_s5 + $0x30] sm:$0xff]  ;;  %v266_v22 = vmul.f32 %v549_v17, %v265_v1  ;;  %v280_v26 = vmul.f32 %v549_v17, %v279_v6  ;;  %v292_v30 = vmul.f32 %v291_v10, %v253_v16  ;;  %v294_v31 = vmul.f32 %v549_v17, %v293_v11 }
  0x7f   : >> { %s1104_s10 = sld [smem:[#allocation36_spill]]  ;;  %v269_v23 = vmul.f32 %v551_v18, %v268_v2  ;;  %v283_v27 = vmul.f32 %v551_v18, %v282_v7  ;;  %v286_v28 = vmul.f32 %v553_v20, %v285_v8  ;;  %v306_v35 = vmul.f32 %v305_v15, %v253_v16 }
  0x80   : >> { %s1105_s3 = sld [smem:[#allocation28_spill]]  ;;  %v308_v36 = vmul.f32 %v549_v17, %v307_v19  ;;  %v295_v38 = vadd.f32 %v294_v31, %v292_v30  ;;  %v344_v15 = vstv %s934_s12 }
  0x81   : >> { %s1106_s0 = sld [smem:[#allocation32_spill]]  ;;  %v263_v0 = vstv %s1100_s7 }
  0x82   : >> { %v271_v3 = vstv %s1101_s6  ;;  %v264_v21 = vmul.f32 %v263_v0, %v253_v16  ;;  %s1107_s4 = sld [smem:[#allocation29_spill]]  ;;  %v309_v42 = vadd.f32 %v308_v36, %v306_v35  ;;  %v347_v35 = vstv %s938_s1 }
  0x83   : >> { %v274_v4 = vstv %s1102_s11  ;;  %s1108_s6 = sld [smem:[#allocation33_spill]]  ;;  %v272_v25 = vmul.f32 %v553_v20, %v271_v3 }
  0x84   : >> { %v277_v5 = vstv %s1103_s8  ;;  %v267_v29 = vadd.f32 %v266_v22, %v264_v21  ;;  %s1109_s18 = sld [smem:[#allocation37_spill]] }
  0x85   : >> { %v288_v9 = vstv %s1104_s10  ;;  %v278_v24 = vmul.f32 %v277_v5, %v253_v16  ;;  %s1111_s5 = sld [smem:[#allocation27_spill]] }
  0x86   : >> { %v296_v12 = vstv %s1105_s3  ;;  %v270_v37 = vadd.f32 %v269_v23, %v267_v29  ;;  %s1112_s3 = sld [smem:[#allocation30_spill]] }
  0x87   : >> { %v299_v13 = vstv %s1106_s0  ;;  %v297_v32 = vmul.f32 %v551_v18, %v296_v12  ;;  %s1110_s0 = sld [smem:[#allocation26_spill]]  ;;  %v281_v33 = vadd.f32 %v280_v26, %v278_v24  ;;  %v358_v26 = vstv %s932_s17 }
  0x88   : >> { %v300_v34 = vmul.f32 %v553_v20, %v299_v13  ;;  %v310_v39 = vstv %s1107_s4  ;;  %s1113_s7 = sld [smem:[#allocation34_spill]]  ;;  %v273_v45 = vadd.f32 %v272_v25, %v270_v37 }
  0x89   : >> { %v313_v40 = vstv %s1108_s6  ;;  %v284_v41 = vadd.f32 %v283_v27, %v281_v33  ;;  %v311_v43 = vmul.f32 %v551_v18, %v310_v39  ;;  %v298_v46 = vadd.f32 %v297_v32, %v295_v38  ;;  %s1114_s8 = sld [smem:[#allocation38_spill]] }
  0x8a   : >> { %v314_v44 = vmul.f32 %v553_v20, %v313_v40  ;;  %v316_v47 = vstv %s1109_s18  ;;  %s1115_s10 = sld [smem:[#allocation39_spill]]  ;;  %v275_v53 = vadd.f32 %v274_v4, %v273_v45  ;;  %v361_v27 = vstv %s936_s22 }
  0x8b   : >> { %v287_v49 = vadd.f32 %v286_v28, %v284_v41  ;;  %v312_v50 = vadd.f32 %v311_v43, %v309_v42  ;;  %v321_v52 = vstv %s1111_s5  ;;  %v301_v54 = vadd.f32 %v300_v34, %v298_v46  ;;  %s1116_s6 = sld [smem:[#allocation41_spill]] }
  0x8c   : >> { %v322_v55 = vmul.f32 %v549_v17, %v321_v52  ;;  %v324_v56 = vstv %s1112_s3  ;;  %s1117_s4 = sld [smem:[#allocation43_spill]]  ;;  %v276_v61 = vmax.f32 %v275_v53, 0.0  ;;  %v364_v38 = vstv %s940_s9 }
  0x8d   : >> { %v319_v48 = vstv %s1110_s0  ;;  %v289_v57 = vadd.f32 %v288_v9, %v287_v49  ;;  %v315_v58 = vadd.f32 %v314_v44, %v312_v50  ;;  %v325_v59 = vmul.f32 %v551_v18, %v324_v56  ;;  %s1118_s11 = sld [smem:[#allocation45_spill]] }
  0x8e   : >> { %v320_v51 = vmul.f32 %v319_v48, %v253_v16  ;;  %v327_v60 = vstv %s1113_s7  ;;  %v303_v62 = vadd.f32 %v302_v14, %v301_v54  ;;  %s1119_s0 = sld [smem:[#allocation40_spill]]  ;;  %v367_v41 = vstv %s942_s2 }
  0x8f   : >> { %v328_v0 = vmul.f32 %v553_v20, %v327_v60  ;;  %v290_v1 = vmax.f32 %v289_v57, 0.0  ;;  %v317_v2 = vadd.f32 %v316_v47, %v315_v58  ;;  %v330_v3 = vstv %s1114_s8  ;;  %s1120_s18 = sld [smem:[#allocation42_spill]] }
  0x90   : >> { %v323_v63 = vadd.f32 %v322_v55, %v320_v51  ;;  %v333_v4 = vstv %s1115_s10  ;;  %v304_v5 = vmax.f32 %v303_v62, 0.0  ;;  %s1121_s3 = sld [smem:[#allocation44_spill]]  ;;  %v369_v44 = vstv %s944_s21  ;;  %s1122_s10 = sshll.u32 %s729_s27, 3 }
  0x91   : >> { %v334_v7 = vmul.f32 %v333_v4, %v276_v61  ;;  %v335_v8 = vstv %s1116_s6  ;;  %v318_v9 = vmax.f32 %v317_v2, 0.0  ;;  %v372_v48 = vstv %s946_s13  ;;  %s250_s27 = sadd.s32 1, %s729_s27  }
  0x92   : >> { %v326_v6 = vadd.f32 %v325_v59, %v323_v63  ;;  %v336_v10 = vmul.f32 %v335_v8, %v290_v1  ;;  %v338_v11 = vstv %s1117_s4  ;;  %p247_p3 = scmp.ge.s32.totalorder %s250_s27, 2  }
  0x93   : >> { %v341_v12 = vstv %s1118_s11  ;;  %v339_v14 = vmul.f32 %v338_v11, %v304_v5  ;;  %v359_v30 = vmul.f32 %v358_v26, %v318_v9  ;;  %s374_s11 = scalar_lea.vmem %s950_s28, %s1122_s10 [#allocation7]  ;;  %s1123_s7 = sld [smem:[#allocation18_spill]] (%p247_p3) }
  0x94   : >> { %v329_v13 = vadd.f32 %v328_v0, %v326_v6  ;;  %v337_v16 = vadd.f32 %v336_v10, %v334_v7  ;;  %v342_v17 = vmul.f32 %v341_v12, %v318_v9  ;;  %v350_v18 = vstv %s1119_s0  ;;  %s1124_s8 = sld [smem:[#allocation23_spill]] (%p247_p3)  ;;  %s389_s10 = sshll.u32 (%p247_p3), %s950_s28, 4  ;;  %s390_s10 = int_to_ptr.vmem [resolvable:$true] %s389_s10 }
  0x95   : >> { %v352_v19 = vstv %s1120_s18  ;;  %v351_v21 = vmul.f32 %v350_v18, %v276_v61  ;;  %s1126_s18 = sld [smem:[#allocation48_spill]] (%p247_p3) }
  0x96   : >> { %v331_v20 = vadd.f32 %v330_v3, %v329_v13  ;;  %v353_v22 = vmul.f32 %v352_v19, %v290_v1  ;;  %v355_v23 = vstv %s1121_s3  ;;  %v340_v24 = vadd.f32 %v339_v14, %v337_v16 }
  0x97   : >> { %v356_v25 = vmul.f32 %v355_v23, %v304_v5 }
  0x98   : >> { %v332_v28 = vmax.f32 %v331_v20, 0.0  ;;  %v354_v29 = vadd.f32 %v353_v22, %v351_v21  ;;  %v343_v31 = vadd.f32 %v342_v17, %v340_v24 }
  0x99   : > { %s560_s5 = sshll.u32 (%p247_p3), %s1123_s7, 4 }
  0x9a   : >> { %v345_v32 = vmul.f32 %v344_v15, %v332_v28  ;;  %v357_v33 = vadd.f32 %v356_v25, %v354_v29  ;;  %v362_v34 = vmul.f32 %v361_v27, %v332_v28  ;;  %s377_s27 = scalar_lea.sflag (%p247_p3), [#allocation4], %s1124_s8 }
  0x9b   : > { %s388_s3 = scalar_lea.hbm (%p247_p3), %s1126_s18, %s560_s5  ;;  %s671_s13 = scalar_lea.hbm (%p247_p3), %s1126_s18, 32 }
  0x9c   : >> { %v346_v36 = vadd.f32 %v345_v32, %v343_v31  ;;  %v360_v37 = vadd.f32 %v359_v30, %v357_v33 }
  0x9e   : >> { %v348_v39 = vadd.f32 %v347_v35, %v346_v36  ;;  %v363_v40 = vadd.f32 %v362_v34, %v360_v37 }
  0xa0   : >> { %v349_v42 = vmax.f32 %v348_v39, 0.0  ;;  %v365_v43 = vadd.f32 %v364_v38, %v363_v40 }
  0xa2   : >> { %v366_v45 = vmax.f32 %v365_v43, 0.0  ;;  %v368_v46 = vmul.f32 %v367_v41, %v349_v42 }
  0xa4   : >> { %v370_v47 = vmul.f32 %v369_v44, %v366_v45 }
  0xa6   : >> { %v371_v49 = vadd.f32 %v370_v47, %v368_v46  ;;  %249 = sbr.rel (!%p247_p3) target bundleno = 123 (0x7b), region = 95 }
  0xa8   : >> { %v373_v50 = vadd.f32 %v372_v48, %v371_v49 }
  0xaa   : >> { %375 = vst [vmem:[%s374_s11] sm:$0xff] %v373_v50  ;;  %s391_s11 = sshll.u32 (%p247_p3), %s388_s3, 4  ;;  %s392_s11 = int_to_ptr.hbm [resolvable:$true] %s391_s11 }
  0xab   : > { %s665_s1 = sshra.s32 %s392_s11, 4  ;;  %s666_s1 = int_to_ptr.hbm [resolvable:$true] %s665_s1 }
  0xac   : > { %s667_s2 = scalar_lea.hbm %s666_s1, 16  ;;  %p672_p7 = scmp.lt.s32.totalorder %s666_s1, %s1126_s18 }
  0xad   : > { %p668_p4 = scmp.ne.s32.totalorder %s666_s1, %s667_s2  ;;  %p673_p8 = scmp.lt.s32.totalorder %s671_s13, %s667_s2 }
  0xaf   : > { %p669_p5 = pnand %p668_p4, %p807_p11  ;;  %p674_p9 = por %p673_p8, %p672_p7 }
  0xb1   : > { %p670_p6 = pneg %p669_p5 }
  0xb3   : > { %p675_p10 = pnand %p674_p9, %p670_p6 }
  0xb5   : > { %678 = shalt.err (!%p675_p10)
}
  0xb6   : > { %s738_s22 = smov 128   ;;  %s739_s19 = smov 8  }
  0xb7   : > { %574 = dma.vmem_to_hbm [thread:$0]  (%p807_p11), %s390_s10, 256, %s392_s11, %s377_s27, %s738_s22, %s738_s22, %s739_s19  }
  0xb8 PF: > { %s1127_s23 = sld [smem:[#allocation14_spill]]  ;;  %p581_p13 = pnand %p498_p2, %p811_p12 }
  0xba   : > { %p582_p1 = pneg %p581_p13 }
  0xbe   : > { %s406_s17 = sand.u32 1, %s1127_s23  }
  0xbf   : > { %s407_s24 = scalar_lea.sflag [#allocation4], %s406_s17 }
  0xc0   : > { %708 = dma.done.wait (%p582_p1), %s407_s24, 256  }
  0xc1   : > { %710 = vsyncadd (%p582_p1), %s407_s24, 4294967040  ;;  %s1130_s12 = sld [smem:[#allocation19_spill]] }
  0xc2   : > { %s1131_s9 = sld [smem:[#allocation15_spill]] }
  0xc3   : > { %s1132_s10 = sld [smem:[#allocation16_spill]] }
  0xc4   : > { %s1133_s11 = sld [smem:[#allocation20_spill]] }
  0xc7   : > { %p16_p0 = scmp.ge.s32.totalorder %s1130_s12, 4  }
  0xc9   :  { %18 = sbr.rel (!%p16_p0) target bundleno = 10 (0xa), region = 106 }
  0xce   :  { %413 = vsyncpa [#allocation3], 1 }
  0xcf   :  { %415 = vsyncpa [#allocation3 + $0x1], 1 }
  0xd0   :  { %416 = vsyncpa [#allocation4], 1 }
  0xd1   :  { %418 = vsyncpa [#allocation4 + $0x1], 1 }
  0xd2   :  { %419 = vsyncpa [#allocation5], 1 }
  0xd3   :  { %421 = vsyncpa [#allocation5 + $0x1], 1 }

</bundles_post_ra>
